<compile_context>
chip_gen: v7x
topology: tpu7x:2x2x1
jax: 0.10.0
libtpu: 0.0.40
codegen_flags: <defaults>
</compile_context>

<pallas_src>
import jax
import jax.numpy as jnp
from jax.experimental import pallas as pl
from jax.experimental.pallas import tpu as pltpu


_TARGET_FILL_BLOCK_BYTES = 4 << 20   # ~4 MiB/block; 2x-buffered < 16 MiB (v5e default)
_TARGET_CONV_BLOCK_BYTES = 2 << 20


def _divisor_col_block(length, bytes_per_col, target_bytes):
    """Largest 128-multiple column block dividing `length` within the byte budget.

    Falls back to the full length when L is not a multiple of 128 (the block
    then equals the full dim, which is always a legal TPU block shape).
    """
    if length % 128 != 0:
        return length
    max_cols = max(128, target_bytes // max(bytes_per_col, 1))
    if length <= max_cols:
        return length
    for cand in (8192, 4096, 2048, 1024, 512, 256, 128):
        if cand <= max_cols and length % cand == 0:
            return cand
    return 128


# ----------------------------------------------------------------------------
# Kernels
# ----------------------------------------------------------------------------
def _fill_kernel(b_ref, o_ref):
    # b_ref: SMEM (1,) f32 bias scalar.  o_ref: VMEM output block.
    o_ref[...] = jnp.full(o_ref.shape, b_ref[0], dtype=o_ref.dtype)


def _bias_fill_rows_kernel(b_ref, o_ref):
    # Defensive C_out > 1 fill.  b_ref: SMEM (c_out,) f32.
    # o_ref: VMEM (row_blk, c_out, col_blk) block of the (N, C_out, L) output.
    row_blk, c_out, col_blk = o_ref.shape
    for c in range(c_out):  # c_out is a Python int; static per-channel stores
        o_ref[:, c, :] = jnp.full((row_blk, col_blk), b_ref[c], dtype=o_ref.dtype)


def _conv1d_k1_vpu_kernel(x_ref, w_ref, b_ref, o_ref):
    # C_out == 1 path: VPU broadcast-multiply + sublane reduction over C_in.
    # x_ref: (c_in, col_blk) of one batch row; w_ref: (c_in, 1);
    # b_ref: SMEM (1,) f32; o_ref: (1, col_blk).
    x = x_ref[...]
    w = w_ref[...].astype(x.dtype)              # multiply in input dtype
    acc = jnp.sum((x * w).astype(jnp.float32), axis=0, keepdims=True) + b_ref[0]
    o_ref[...] = acc.astype(o_ref.dtype)


def _conv1d_k1_mxu_kernel(x_ref, w_ref, b_ref, o_ref):
    # Defensive C_out > 1 path: (c_out, c_in) @ (c_in, col_blk), f32 accumulate.
    acc = jnp.dot(w_ref[...], x_ref[...], preferred_element_type=jnp.float32)
    o_ref[...] = (acc + b_ref[...].astype(jnp.float32)).astype(o_ref.dtype)


# ----------------------------------------------------------------------------
# Wrappers
# ----------------------------------------------------------------------------
def _bias_broadcast_c1(bias, n, length, dtype):
    """C_in == 0, C_out == 1: output is exactly bias broadcast to (N, 1, L)."""
    itemsize = jnp.dtype(dtype).itemsize
    b1 = bias.reshape(1).astype(jnp.float32)
    total = n * length

    if total <= 8 * 128:
        # Tiny output (shipped case): one full (8,128) tile, no grid, unmasked vst.
        tile = pl.pallas_call(
            _fill_kernel,
            out_shape=jax.ShapeDtypeStruct((8, 128), dtype),
            in_specs=[pl.BlockSpec(memory_space=pltpu.MemorySpace.SMEM)],
        )(b1)
        return tile.reshape(-1)[:total].reshape(n, 1, length)

    # Large fill: write (N, 1, L) directly, ~4 MiB blocks, no post-kernel slice.
    col_blk = _divisor_col_block(length, itemsize, _TARGET_FILL_BLOCK_BYTES)
    n_col_tiles = length // col_blk
    row_blk = min(n, max(1, _TARGET_FILL_BLOCK_BYTES // (col_blk * itemsize)))
    n_row_tiles = pl.cdiv(n, row_blk)
    if n_row_tiles * n_col_tiles == 1 and n >= 2:
        # >= 2 parallel blocks so v7x's second TensorCore participates.
        row_blk = -(-n // 2)
        n_row_tiles = pl.cdiv(n, row_blk)

    return pl.pallas_call(
        _fill_kernel,
        out_shape=jax.ShapeDtypeStruct((n, 1, length), dtype),
        grid=(n_row_tiles, n_col_tiles),
        in_specs=[pl.BlockSpec(memory_space=pltpu.MemorySpace.SMEM)],
        out_specs=pl.BlockSpec((row_blk, 1, col_blk), lambda i, j: (i, 0, j)),
        compiler_params=pltpu.CompilerParams(
            dimension_semantics=("parallel", "parallel")),
    )(b1)


def _bias_broadcast_general(bias, n, c_out, length, dtype):
    """C_in == 0, C_out > 1 (defensive; not hit by this module)."""
    itemsize = jnp.dtype(dtype).itemsize
    bf = bias.reshape(c_out).astype(jnp.float32)
    col_blk = _divisor_col_block(length, itemsize * c_out, _TARGET_FILL_BLOCK_BYTES)
    n_col_tiles = length // col_blk
    row_blk = min(n, max(1, _TARGET_FILL_BLOCK_BYTES // (col_blk * c_out * itemsize)))
    n_row_tiles = pl.cdiv(n, row_blk)

    return pl.pallas_call(
        _bias_fill_rows_kernel,
        out_shape=jax.ShapeDtypeStruct((n, c_out, length), dtype),
        grid=(n_row_tiles, n_col_tiles),
        in_specs=[pl.BlockSpec(memory_space=pltpu.MemorySpace.SMEM)],
        out_specs=pl.BlockSpec((row_blk, c_out, col_blk), lambda i, j: (i, 0, j)),
        compiler_params=pltpu.CompilerParams(
            dimension_semantics=("parallel", "parallel")),
    )(bf)


def _conv1d_k1_pos(x, weight, bias):
    """General kernel_size==1, stride=1, padding=0 conv (C_in > 0), NCL layout."""
    n, c_in, length = x.shape
    c_out = weight.shape[0]
    dtype = x.dtype
    itemsize = jnp.dtype(dtype).itemsize

    # Column block: lane-dense, divides L exactly -> no wrapper pad/slice, and
    # the kernel writes straight into the final (N, C_out, L) layout.
    col_blk = _divisor_col_block(length, itemsize * (c_in + c_out),
                                 _TARGET_CONV_BLOCK_BYTES)
    grid = (n, length // col_blk)
    params = pltpu.CompilerParams(dimension_semantics=("parallel", "parallel"))

    if c_out == 1:
        # Tiny output-channel count: VPU broadcast-multiply + sublane reduce
        # (an MXU matmul would use <1% of a 256x256 array).
        w2 = weight[:, :, 0].T                              # (c_in, 1)
        b1 = bias.reshape(1).astype(jnp.float32)
        return pl.pallas_call(
            _conv1d_k1_vpu_kernel,
            out_shape=jax.ShapeDtypeStruct((n, 1, length), dtype),
            grid=grid,
            in_specs=[
                pl.BlockSpec((pl.Squeezed(), c_in, col_blk), lambda i, j: (i, 0, j)),
                pl.BlockSpec((c_in, 1), lambda i, j: (0, 0)),
                pl.BlockSpec(memory_space=pltpu.MemorySpace.SMEM),
            ],
            out_specs=pl.BlockSpec((pl.Squeezed(), 1, col_blk),
                                   lambda i, j: (i, 0, j)),
            compiler_params=params,
        )(x, w2, b1)

    # Defensive C_out > 1 path: MXU matmul per (batch, column-tile).
    w2 = weight[:, :, 0]                                    # (c_out, c_in)
    b2 = bias.reshape(c_out, 1).astype(jnp.float32)
    return pl.pallas_call(
        _conv1d_k1_mxu_kernel,
        out_shape=jax.ShapeDtypeStruct((n, c_out, length), dtype),
        grid=grid,
        in_specs=[
            pl.BlockSpec((pl.Squeezed(), c_in, col_blk), lambda i, j: (i, 0, j)),
            pl.BlockSpec((c_out, c_in), lambda i, j: (0, 0)),
            pl.BlockSpec((c_out, 1), lambda i, j: (0, 0)),
        ],
        out_specs=pl.BlockSpec((pl.Squeezed(), c_out, col_blk),
                               lambda i, j: (i, 0, j)),
        compiler_params=params,
    )(x, w2, b2)


def conv1d_k1(x, weight, bias):
    """Conv1d with kernel_size=1, stride=1, padding=0 on NCL input."""
    n, c_in, length = x.shape
    c_out = weight.shape[0]

    # Zero-sized output: nothing to compute (can't launch a zero-size kernel).
    if n * c_out * length == 0:
        return jnp.zeros((n, c_out, length), dtype=x.dtype)

    if c_in == 0:
        # Empty channel reduction -> pure bias broadcast.
        if c_out == 1:
            return _bias_broadcast_c1(bias, n, length, x.dtype)
        return _bias_broadcast_general(bias, n, c_out, length, x.dtype)

    return _conv1d_k1_pos(x, weight, bias)


if __name__ == "__main__":
    key = jax.random.PRNGKey(0)
    kw, kb, kx, kw2, kx2 = jax.random.split(key, 5)

    N, C_IN, C_OUT, L = 2, 0, 1, 16

    # Module parameter shapes: weight (C_OUT, C_IN, 1) == (1, 0, 1) (empty),
    # bias (C_OUT,) == (1,).
    weight = jax.random.normal(kw, (C_OUT, C_IN, 1), dtype=jnp.float32)
    bias = jax.random.normal(kb, (C_OUT,), dtype=jnp.float32)

    # Zero-size input channel dim, matching the PyTorch case: (N, 0, L).
    x = jax.random.normal(kx, (N, C_IN, L), dtype=jnp.float32)

    out = jax.block_until_ready(conv1d_k1(x, weight, bias))
    ref = jnp.broadcast_to(bias[None, :, None], (N, C_OUT, L)).astype(jnp.float32)
    assert out.shape == (N, C_OUT, L), out.shape
    assert out.dtype == jnp.float32, out.dtype
    assert jnp.allclose(out, ref, atol=1e-6), (out, ref)

    # Secondary check of the general (C_in > 0) kernel_size==1 path.
    C_IN2 = 4
    weight2 = jax.random.normal(kw2, (C_OUT, C_IN2, 1), dtype=jnp.float32)
    x2 = jax.random.normal(kx2, (N, C_IN2, L), dtype=jnp.float32)
    out2 = jax.block_until_ready(conv1d_k1(x2, weight2, bias))
    ref2 = jnp.einsum("oc,ncl->nol", weight2[:, :, 0], x2) + bias[None, :, None]
    assert out2.shape == (N, C_OUT, L), out2.shape
    assert jnp.allclose(out2, ref2, atol=1e-5, rtol=1e-5), (out2, ref2)

    print("KERNEL_OK")
</pallas_src>

<mosaic_0001>
module attributes {stable_mosaic.version = 11 : i64} {
  func.func @_fill_kernel(%arg0: memref<1xf32, #tpu.memory_space<smem>>, %arg1: memref<8x128xf32, #tpu.memory_space<vmem>>) attributes {dimension_semantics = [], scalar_prefetch = 0 : i64, scratch_operands = 0 : i64, tpu.core_type = #tpu.core_type<tc>} {
    %c0 = arith.constant 0 : index
    %0 = memref.load %arg0[%c0] : memref<1xf32, #tpu.memory_space<smem>>
    %1 = vector.broadcast %0 : f32 to vector<8x128xf32>
    %c0_0 = arith.constant 0 : index
    %c0_1 = arith.constant 0 : index
    %2 = vector.load %arg1[%c0_0, %c0_1] : memref<8x128xf32, #tpu.memory_space<vmem>>, vector<8x128xf32>
    tpu.vector_store %arg1[%c0_0, %c0_1], %1 {strides = array<i32>} : memref<8x128xf32, #tpu.memory_space<vmem>>, vector<8x128xf32>,
    return
  }
}

</mosaic_0001>

<bundles_post_ra>
// kernel: tpu_custom_call.1
= control target key start
LH: loop header
LB: loop body
LE: loop exit
PB: predicated region body
PF: predicated region fallthrough
CT: control target
= control target key end

     0   :  { %s78_s0 = inlined_call_operand.<no memory space> [shape: f32[1], index: 0, kind: input, shape index: {}]   ;;  %s79_s1 = inlined_call_operand.hbm [shape: f32[8,128], index: 1, kind: output, shape index: {}]  }
   0x1   :  { %v11_v0 = vstv %s78_s0 }
   0x2   :  { %7 = vsyncpa [#allocation4], 0  ;;  %12 = vst [vmem:[#allocation3] sm:$0xff] %v11_v0  ;;  %s52_s8 = smov [#allocation3]  }
   0x3   :  { %s19_s9 = sshll.u32 %s52_s8, 4  ;;  %s20_s9 = int_to_ptr.vmem [resolvable:$true] %s19_s9 }
   0x4   :  { %s28_s10 = scalar_lea.vmem %s20_s9, 128  ;;  %p33_p1 = scmp.lt.s32.totalorder %s20_s9, %s20_s9 }
   0x5   :  { %p29_p0 = scmp.ne.s32.totalorder %s20_s9, %s28_s10  ;;  %p34_p2 = scmp.lt.s32.totalorder %s28_s10, %s28_s10 }
   0x7   :  { %p35_p3 = por %p34_p2, %p33_p1 }
   0x9   :  { %p36_p4 = pnand %p35_p3, %p29_p0 }
   0xb   :  { %39 = shalt.err (!%p36_p4)
}
   0xc   :  { %s40_s13 = scalar_lea.hbm %s79_s1, 128 }
   0xd   :  { %p41_p5 = scmp.ne.s32.totalorder %s79_s1, %s40_s13  ;;  %p44_p6 = scmp.lt.u32.totalorder %s40_s13, %s79_s1 }
   0xf   :  { %p46_p7 = pnand %p44_p6, %p41_p5 }
  0x11   :  { %49 = shalt.err (!%p46_p7)
}
  0x12   :  { %22 = dma.vmem_to_hbm [thread:$0]  %s20_s9, 128, %s79_s1, [#allocation4]  }
  0x13   :  { %50 = dma.done.wait [#allocation4], 128  }
  0x14   :  { %51 = vsyncadd [#allocation4], 4294967168 }
  0x15   :  { %26 = vsyncpa [#allocation4], 1 }

</bundles_post_ra>
